<compile_context>
chip_gen: v7x
topology: tpu7x:2x2x1
jax: 0.10.0
libtpu: 0.0.40
codegen_flags: <defaults>
</compile_context>

<pallas_src>
import jax
import jax.numpy as jnp
from jax.experimental import pallas as pl
from jax.experimental.pallas import tpu as pltpu


def _patch_unembed_kernel(x_ref, o_ref):
    # x_ref: (1, T_HW, T_C) tile, o_ref: (1, T_C, T_HW) tile (transposed placement)
    o_ref[...] = jnp.swapaxes(x_ref[...], 1, 2)


def _choose_t_hw(HW, C, itemsize, max_tile=2048, per_buf_budget=4 * 1024 * 1024):
    """Largest tile along HW that (a) divides HW, (b) is a multiple of 128 (or == HW),
    and (c) keeps one (T_HW, C) buffer under per_buf_budget bytes."""
    cap = max(per_buf_budget // max(C * itemsize, 1), 128)
    cap = min(max_tile, cap)
    if HW <= cap:
        return HW  # single tile per (b, c-slab); full-dim exemption applies
    # Largest multiple-of-128 divisor of HW not exceeding cap (lane-dense stores).
    t = (cap // 128) * 128
    while t >= 128:
        if HW % t == 0:
            return t
        t -= 128
    # Fallback: largest multiple-of-8 divisor (still legal, just not lane-ideal).
    t = (cap // 8) * 8
    while t >= 8:
        if HW % t == 0:
            return t
        t -= 8
    return HW  # no clean divisor — one block per (b, c-slab)


def patch_unembed(x, x_size):
    """x: (B, HW, C) array, x_size: (H, W) python ints. Returns (B, C, H, W)."""
    B, HW, C = x.shape
    H, W = x_size
    assert HW == H * W, "HW must equal H*W"

    itemsize = jnp.dtype(x.dtype).itemsize
    t_hw = _choose_t_hw(HW, C, itemsize)
    t_c = C  # full channel dim (small for SwinIR); full-dim exemption on (8,128) rule
    n_hw = HW // t_hw
    n_c = C // t_c

    out_chw = pl.pallas_call(
        _patch_unembed_kernel,
        out_shape=jax.ShapeDtypeStruct((B, C, HW), x.dtype),
        grid_spec=pltpu.PrefetchScalarGridSpec(
            num_scalar_prefetch=0,
            grid=(B, n_hw, n_c),
            in_specs=[
                pl.BlockSpec((1, t_hw, t_c), lambda b, i, j: (b, i, j)),
            ],
            # Transposed tile placement: (b, i, j) -> (b, j, i).
            out_specs=pl.BlockSpec((1, t_c, t_hw), lambda b, i, j: (b, j, i)),
        ),
        compiler_params=pltpu.CompilerParams(
            dimension_semantics=("parallel", "parallel", "parallel"),
        ),
        cost_estimate=pl.CostEstimate(
            flops=0,
            transcendentals=0,
            bytes_accessed=2 * B * HW * C * itemsize,
        ),
    )(x)

    # Pure reshape (no data reordering beyond what the kernel did).
    return out_chw.reshape(B, C, H, W)


def _ref(x, x_size):
    B, HW, C = x.shape
    H, W = x_size
    return jnp.transpose(x, (0, 2, 1)).reshape(B, C, H, W)


if __name__ == "__main__":
    key = jax.random.PRNGKey(0)

    # Case 1: small shape consistent with the module (embed_dim C=32, spatial 8x8).
    B1, H1, W1, C1 = 2, 8, 8, 32
    x1 = jax.random.normal(key, (B1, H1 * W1, C1), dtype=jnp.float32)
    out1 = jax.block_until_ready(patch_unembed(x1, (H1, W1)))
    assert out1.shape == (B1, C1, H1, W1)
    assert jnp.array_equal(out1, _ref(x1, (H1, W1)))

    # Case 2: exercises the tiled path (HW = 2304 > tile cap -> multi-tile grid).
    B2, H2, W2, C2 = 1, 48, 48, 96
    x2 = jax.random.normal(jax.random.PRNGKey(0), (B2, H2 * W2, C2), dtype=jnp.float32)
    out2 = jax.block_until_ready(patch_unembed(x2, (H2, W2)))
    assert out2.shape == (B2, C2, H2, W2)
    assert jnp.array_equal(out2, _ref(x2, (H2, W2)))

    print("KERNEL_OK")
</pallas_src>

<mosaic_0001>
module attributes {stable_mosaic.version = 11 : i64} {
  func.func @_patch_unembed_kernel(%arg0: i32, %arg1: i32, %arg2: i32, %arg3: memref<1x64x32xf32, #tpu.memory_space<vmem>>, %arg4: memref<1x32x64xf32, #tpu.memory_space<vmem>>) attributes {dimension_semantics = [#tpu.dimension_semantics<parallel>, #tpu.dimension_semantics<parallel>, #tpu.dimension_semantics<parallel>], iteration_bounds = array<i64: 2, 1, 1>, scalar_prefetch = 0 : i64, scratch_operands = 0 : i64, tpu.core_type = #tpu.core_type<tc>, window_params = [{transform_indices = @transform_0, window_bounds = array<i64: 1, 64, 32>}, {transform_indices = @transform_1, window_bounds = array<i64: 1, 32, 64>}]} {
    %c0 = arith.constant 0 : index
    %c0_0 = arith.constant 0 : index
    %c0_1 = arith.constant 0 : index
    %0 = vector.load %arg3[%c0, %c0_0, %c0_1] : memref<1x64x32xf32, #tpu.memory_space<vmem>>, vector<1x64x32xf32>
    %1 = tpu.transpose %0, [0, 2, 1] : vector<1x64x32xf32> -> vector<1x32x64xf32>
    %c0_2 = arith.constant 0 : index
    %c0_3 = arith.constant 0 : index
    %c0_4 = arith.constant 0 : index
    %2 = vector.load %arg4[%c0_2, %c0_3, %c0_4] : memref<1x32x64xf32, #tpu.memory_space<vmem>>, vector<1x32x64xf32>
    tpu.vector_store %arg4[%c0_2, %c0_3, %c0_4], %1 {strides = array<i32>} : memref<1x32x64xf32, #tpu.memory_space<vmem>>, vector<1x32x64xf32>,
    return
  }
  func.func @transform_0(%arg0: i32, %arg1: i32, %arg2: i32) -> (i32, i32, i32) {
    %c0_i32 = arith.constant 0 : i32
    return %arg0, %arg1, %arg2 : i32, i32, i32
  }
  func.func @transform_1(%arg0: i32, %arg1: i32, %arg2: i32) -> (i32, i32, i32) {
    %c0_i32 = arith.constant 0 : i32
    return %arg0, %arg2, %arg1 : i32, i32, i32
  }
}

</mosaic_0001>

<bundles_post_ra>
// kernel: tpu_custom_call.1
= control target key start
LH: loop header
LB: loop body
LE: loop exit
PB: predicated region body
PF: predicated region fallthrough
CT: control target
= control target key end

     0   :  { %6 = vsyncpa [#allocation3], 0  ;;  %s595_s0 = inlined_call_operand.vmem [shape: f32[2,64,32], index: 0, kind: input, shape index: {}]   ;;  %s596_s1 = inlined_call_operand.hbm [shape: f32[2,32,64], index: 1, kind: output, shape index: {}]  }
   0x1   :  { %8 = vsyncpa [#allocation3 + $0x1], 0  ;;  %s480_s6 = smov 0   ;;  %s482_s7 = smov 0  }
   0x2   :  { %s484_s8 = smov 0   ;;  %s486_s9 = smov 0  }
   0x3   :  { %s488_s10 = smov 0   ;;  %s490_s11 = smov 0  }
   0x4 LB: > { %s314_s12 = sadd.s32 4294967295, %s465_s11   ;;  %s315_s13 = sadd.s32 4294967294, %s465_s11   ;;  %s465_s11 = sphi %s490_s11, %s14_s11   ;;  %s461_s10 = sphi %s488_s10, %s603_s10   ;;  %s457_s9 = sphi %s486_s9, %s602_s9   ;;  %s453_s8 = sphi %s484_s8, %s601_s8   ;;  %s449_s7 = sphi %s482_s7, %s600_s7   ;;  %s445_s6 = sphi %s480_s6, %s599_s6  }
   0x5   : > { %s33_s14 = sadd.s32 1, %s461_s10  ;;  %s74_s15 = sadd.s32 1, %s453_s8 }
   0x6   : > { %p35_p0 = scmp.ge.s32.totalorder %s33_s14, 2  ;;  %p84_p1 = scmp.ne.s32.totalorder %s453_s8, %s449_s7 }
   0x7   : > { %p85_p2 = scmp.eq.s32.totalorder %s314_s12, 1  ;;  %p90_p3 = scmp.ne.s32.totalorder %s449_s7, %s445_s6 }
   0x8   : > { %s605_s14 = smov (%p35_p0, %s33_s14), 0  ;;  %p91_p5 = scmp.eq.s32.totalorder %s315_s13, 1 }
   0x9   : > { %p520_p4 = por %p85_p2, %p84_p1  ;;  %s67_s17 = ssub.s32 %s461_s10, %s605_s14 }
   0xa   : > { %p318_p6 = scmp.ge.s32.totalorder %s465_s11, 1  ;;  %p72_p7 = scmp.eq.s32.totalorder %s67_s17, 0 }
   0xb   : > { %p527_p8 = por %p91_p5, %p90_p3  ;;  %p125_p9 = scmp.lt.s32.totalorder %s465_s11, 3 }
   0xc   : > { %s533_s19 = scalar_select %p72_p7, %s453_s8, %s74_s15  }
   0xd   : > { %p126_p10 = pnand %p318_p6, %p125_p9 }
   0xe   : > { %p153_p11 = scmp.lt.s32.totalorder (!%p126_p10), %s457_s9, 1  ;;  %s149_s25 = sand.u32 (!%p126_p10), 1, %s449_s7   ;;  %vm206_vm0 = vcmask (!%p126_p10), 523264  }
   0xf   : > { %129 = sbr.rel (%p126_p10) target bundleno = 183 (0xb7), region = 24  ;;  %s319_s26 = sshll.u32 (!%p126_p10), %s149_s25, 5 }
  0x10   : > { %s151_s27 = scalar_lea.vmem (!%p126_p10), [#allocation2], %s319_s26  ;;  %s328_s29 = sshll.u32 (!%p126_p10), %s457_s9, 9 }
  0x11   : > { %s228_s28 = sshll.u32 (!%p126_p10), %s151_s27, 4  ;;  %s547_s3 = scalar_lea.hbm (!%p126_p10), %s596_s1, %s328_s29  ;;  %s542_s28 = int_to_ptr.vmem [resolvable:$true] %s228_s28 }
  0x12   : > { %s549_s4 = scalar_lea.sflag (!%p126_p10), [#allocation3], %s149_s25  ;;  %s387_s5 = scalar_lea.vmem (!%p126_p10), %s542_s28, 512 }
  0x13   : > { %p388_p12 = scmp.ne.s32.totalorder (!%p126_p10), %s542_s28, %s387_s5 }
  0x15   : > { %p389_p13 = pnand (!%p126_p10), %p388_p12, %p520_p4 }
  0x16   : > { %s154_s20 = scalar_select %p153_p11, %s457_s9, 1 }
  0x17   : > { %p390_p0 = pneg %p389_p13  ;;  %s467_s9 = smov [#allocation2]  }
  0x18   : > { %s327_s21 = sshll.u32 %s154_s20, 6  ;;  %s391_s12 = sshll.u32 %s467_s9, 4  ;;  %s392_s12 = int_to_ptr.vmem [resolvable:$false] %s391_s12 }
  0x19   : > { %s163_s24 = scalar_lea.vmem %s595_s0, %s327_s21  ;;  %s393_s13 = scalar_lea.vmem %s392_s12, 1024 }
  0x1a   : > { %v166_v0 = vld [vmem:[%s163_s24] sm:$0xff]  ;;  %v167_v1 = vld [vmem:[%s163_s24 + $0x8] sm:$0xff]  ;;  %v168_v2 = vld [vmem:[%s163_s24 + $0x10] sm:$0xff]  ;;  %p394_p1 = scmp.lt.s32.totalorder %s542_s28, %s392_s12  ;;  %p395_p2 = scmp.lt.s32.totalorder %s393_s13, %s387_s5 }
  0x1b   : > { %174 = vxpose.xlu0.b32.start [1/8] (short) (narrow) %v166_v0, 32  ;;  %v169_v3 = vld [vmem:[%s163_s24 + $0x18] sm:$0xff]  ;;  %v170_v4 = vld [vmem:[%s163_s24 + $0x20] sm:$0xff]  ;;  %v171_v5 = vld [vmem:[%s163_s24 + $0x28] sm:$0xff] }
  0x1c   : > { %v172_v6 = vld [vmem:[%s163_s24 + $0x30] sm:$0xff]  ;;  %v173_v7 = vld [vmem:[%s163_s24 + $0x38] sm:$0xff]  ;;  %p396_p3 = por %p395_p2, %p394_p1 }
  0x1e   : > { %p397_p5 = pnand %p396_p3, %p390_p0 }
  0x1f   : > { %175 = vxpose.xlu0.b32.cont [2/8] (short) (narrow) %v167_v1, 32 }
  0x23   : > { %176 = vxpose.xlu0.b32.cont [3/8] (short) (narrow) %v168_v2, 32 }
  0x27   : > { %177 = vxpose.xlu0.b32.cont [4/8] (short) (narrow) %v169_v3, 32 }
  0x2b   : > { %178 = vxpose.xlu0.b32.cont [5/8] (short) (narrow) %v170_v4, 32 }
  0x2f   : > { %179 = vxpose.xlu0.b32.cont [6/8] (short) (narrow) %v171_v5, 32 }
  0x33   : > { %180 = vxpose.xlu0.b32.cont [7/8] (short) (narrow) %v172_v6, 32 }
  0x37   : > { %181 = vxpose.xlu0.b32.end [8/8] (short) (narrow) %v173_v7, 32 }
  0x9b   : > { %v190_v8 = vpop.trf.xlu0 }
  0x9c   : > { %207 = vst.msk [vmem:[%s151_s27] sm:$0xff] %vm206_vm0, %v190_v8 }
  0x9f   : > { %v191_v9 = vpop.trf.xlu0 }
  0xa0   : > { %208 = vst.msk [vmem:[%s151_s27 + $0x8] sm:$0xff] %vm206_vm0, %v191_v9 }
  0xa3   : > { %v192_v10 = vpop.trf.xlu0 }
  0xa4   : > { %209 = vst.msk [vmem:[%s151_s27 + $0x10] sm:$0xff] %vm206_vm0, %v192_v10 }
  0xa7   : > { %v193_v11 = vpop.trf.xlu0 }
  0xa8   : > { %210 = vst.msk [vmem:[%s151_s27 + $0x18] sm:$0xff] %vm206_vm0, %v193_v11 }
  0xa9   : > { %400 = shalt.err (!%p397_p5)
}
  0xaa   : > { %s401_s15 = scalar_lea.hbm %s547_s3, 512  ;;  %s405_s21 = scalar_lea.hbm %s596_s1, 1024 }
  0xab   : > { %p402_p6 = scmp.ne.s32.totalorder %s547_s3, %s401_s15  ;;  %p406_p10 = scmp.lt.u32.totalorder %s547_s3, %s596_s1 }
  0xac   : > { %p407_p11 = scmp.lt.u32.totalorder %s405_s21, %s401_s15  ;;  %p409_p13 = scmp.lt.u32.totalorder %s401_s15, %s547_s3 }
  0xad   : > { %p403_p7 = pnand %p402_p6, %p520_p4 }
  0xae   : > { %p408_p12 = por %p407_p11, %p406_p10 }
  0xaf   : > { %p404_p9 = pneg %p403_p7 }
  0xb0   : > { %p410_p0 = por %p409_p13, %p408_p12 }
  0xb2   : > { %p411_p1 = pnand %p410_p0, %p404_p9 }
  0xb4   : > { %414 = shalt.err (!%p411_p1)
}
  0xb5   : > { %s468_s24 = smov 128   ;;  %s469_s25 = smov 8  }
  0xb6   : > { %329 = dma.vmem_to_hbm [thread:$0]  (%p520_p4), %s542_s28, 512, %s547_s3, %s549_s4, %s468_s24, %s468_s24, %s469_s25  }
  0xb7 PF: > { %p335_p2 = scmp.ge.s32.totalorder %s465_s11, 2  ;;  %s243_s26 = sand.u32 1, %s445_s6  }
  0xb8   : > { %s244_s27 = scalar_lea.sflag [#allocation3], %s243_s26 }
  0xb9   : > { %p332_p3 = pnand %p335_p2, %p527_p8 }
  0xbb   : > { %440 = dma.done.wait (!%p332_p3), %s244_s27, 512  }
  0xbc   : > { %442 = vsyncadd (!%p332_p3), %s244_s27, 4294966784  ;;  %s14_s11 = sadd.s32 1, %s465_s11   ;;  %s599_s6 = smov %s449_s7 }
  0xbd   : > { %p11_p5 = scmp.ge.s32.totalorder %s14_s11, 4   ;;  %s600_s7 = smov %s453_s8 }
  0xbe   : > { %s601_s8 = smov %s533_s19  ;;  %s602_s9 = smov %s461_s10 }
  0xbf   : > { %s603_s10 = smov %s605_s14  ;;  %13 = sbr.rel (!%p11_p5) target bundleno = 4 (0x4), region = 59 }
  0xc6   :  { %249 = vsyncpa [#allocation3], 1 }
  0xc7   :  { %251 = vsyncpa [#allocation3 + $0x1], 1 }

</bundles_post_ra>
